<compile_context>
chip_gen: v6e
topology: v6e:2x2x1
jax: 0.10.0
libtpu: 0.0.40
codegen_flags: <defaults>
</compile_context>

<pallas_src>
import jax
import jax.numpy as jnp
from jax import lax
from jax.experimental import pallas as pl
from jax.experimental.pallas import tpu as pltpu


def _round_up(n, m):
    return ((n + m - 1) // m) * m


def _pick_tile(n, align, max_tile):
    """Return (n_padded, tile).

    Pads `n` only to the hardware minimum `align` and picks a tile <= max_tile
    that divides the padded extent (>= 2 grid steps when tiled). Falls back to
    bounded extra padding only if no reasonable divisor exists — never rounds
    up by the full tile like the previous version did.
    """
    n_al = _round_up(n, align)
    if n_al <= max_tile:
        return n_al, n_al                      # single resident block
    best = align
    t = align
    limit = min(max_tile, n_al // 2)
    while t <= limit:
        if n_al % t == 0:
            best = t
        t += align
    if best >= 8 * align:
        return n_al, best
    tile = min(max_tile, 16 * align)           # bounded-padding fallback
    return _round_up(n_al, tile), tile


# ---------------------------------------------------------------------------
# Specialized path for the module's actual shapes: n_feature == n_output == 1.
#
# Layout: samples tiled 2-D as [rows, 128] (sublane x lane). Each grid step
# loads one (TR, 128) f32 block, runs 2*H VPU FMAs per element against SMEM
# scalar weights, and stores one lane-dense block.
# ---------------------------------------------------------------------------
def _make_vpu_kernel(n_hidden):
    def kernel(x_ref, w1_ref, b1_ref, w2_ref, b2_ref, o_ref):
        x = x_ref[...]                                         # [TR, 128] f32

        def body(k, acc):
            h = jnp.maximum(x * w1_ref[k] + b1_ref[k], 0.0)    # VPU FMA + max
            return acc + h * w2_ref[k]                         # VPU FMA

        acc0 = jnp.full_like(x, b2_ref[0])
        o_ref[...] = lax.fori_loop(0, n_hidden, body, acc0, unroll=True)

    return kernel


def _forward_vpu(x, w1, b1, w2, b2):
    N = x.shape[0]
    H = w1.shape[0]

    n_rows = pl.cdiv(N, 128)
    rows_pad, TR = _pick_tile(n_rows, 8, 512)   # 256-512 row tiles for big N
    N_pad = rows_pad * 128

    # Pad only to the 8x128 minimum; one cheap pad+reshape, no tile-scale copy.
    xf = x.astype(jnp.float32).reshape(-1)
    x2d = jnp.pad(xf, (0, N_pad - N)).reshape(rows_pad, 128)

    # Tiny parameter vectors go to SMEM (scalar loads inside the kernel).
    w1v = w1.astype(jnp.float32).reshape(H)
    b1v = b1.astype(jnp.float32).reshape(H)
    w2v = w2.astype(jnp.float32).reshape(H)     # predict.weight is [1, H]
    b2v = b2.astype(jnp.float32).reshape(1)

    smem = pl.BlockSpec(memory_space=pltpu.MemorySpace.SMEM)
    cost = pl.CostEstimate(
        flops=4 * N_pad * H,                    # 2 FMAs per hidden unit/sample
        transcendentals=0,
        bytes_accessed=4 * (2 * N_pad + 3 * H + 1),
    )

    out2d = pl.pallas_call(
        _make_vpu_kernel(H),
        out_shape=jax.ShapeDtypeStruct((rows_pad, 128), jnp.float32),
        grid=(rows_pad // TR,),
        in_specs=[
            pl.BlockSpec((TR, 128), lambda i: (i, 0)),   # streamed sample tile
            smem, smem, smem, smem,                      # resident SMEM scalars
        ],
        out_specs=pl.BlockSpec((TR, 128), lambda i: (i, 0)),
        compiler_params=pltpu.CompilerParams(
            dimension_semantics=("parallel",)),
        cost_estimate=cost,
    )(x2d, w1v, b1v, w2v, b2v)

    # Padded samples produce relu(b1)@w2 + b2 garbage; slice them off.
    return out2d.reshape(-1)[:N].reshape(N, 1)


# ---------------------------------------------------------------------------
# General fallback (n_feature > 1 or n_output > 1): MXU matmuls with bf16
# operands / f32 accumulation, K-tiling over the feature axis, and an
# un-padded [TM, O] output.
# ---------------------------------------------------------------------------
def _mlp_kernel_mxu(x_ref, w1_ref, b1_ref, w2_ref, b2_ref, o_ref, h_acc):
    kf = pl.program_id(1)

    @pl.when(kf == 0)
    def _():
        h_acc[...] = jnp.zeros_like(h_acc)

    h_acc[...] += jnp.dot(x_ref[...], w1_ref[...],
                          preferred_element_type=jnp.float32)

    @pl.when(kf == pl.num_programs(1) - 1)
    def _():
        h = jnp.maximum(h_acc[...] + b1_ref[...], 0.0).astype(w2_ref.dtype)
        o_ref[...] = (
            jnp.dot(h, w2_ref[...], preferred_element_type=jnp.float32)
            + b2_ref[...]
        ).astype(o_ref.dtype)


def _forward_mxu(x, w1, b1, w2, b2):
    N, F = x.shape
    H = w1.shape[0]
    O = w2.shape[0]

    N_pad, TM = _pick_tile(N, 8, 256)
    if F <= 512:
        F_pad, TK = F, F            # single K step; full-extent block is legal
    else:
        F_pad, TK = _pick_tile(F, 128, 512)

    # bf16 matmul operands (MXU-native on v5e/v6e/v7x); biases/acc stay f32.
    x_p = jnp.zeros((N_pad, F_pad), jnp.bfloat16).at[:N, :F].set(
        x.astype(jnp.bfloat16))
    w1t = jnp.zeros((F_pad, H), jnp.bfloat16).at[:F, :].set(
        w1.astype(jnp.bfloat16).T)
    b1r = b1.astype(jnp.float32).reshape(1, H)
    w2t = w2.astype(jnp.bfloat16).T              # [H, O]
    b2r = b2.astype(jnp.float32).reshape(1, O)

    resident = lambda i, k: (0, 0)
    out = pl.pallas_call(
        _mlp_kernel_mxu,
        out_shape=jax.ShapeDtypeStruct((N_pad, O), jnp.float32),
        grid=(N_pad // TM, F_pad // TK),
        in_specs=[
            pl.BlockSpec((TM, TK), lambda i, k: (i, k)),   # streamed x tile
            pl.BlockSpec((TK, H), lambda i, k: (k, 0)),    # W1^T K-slab
            pl.BlockSpec((1, H), resident),                # b1 (resident)
            pl.BlockSpec((H, O), resident),                # W2^T (resident)
            pl.BlockSpec((1, O), resident),                # b2 (resident)
        ],
        out_specs=pl.BlockSpec((TM, O), lambda i, k: (i, 0)),  # O not padded
        scratch_shapes=[pltpu.VMEM((TM, H), jnp.float32)],
        compiler_params=pltpu.CompilerParams(
            dimension_semantics=("parallel", "arbitrary")),
        cost_estimate=pl.CostEstimate(
            flops=2 * N_pad * H * (F_pad + O),
            transcendentals=0,
            bytes_accessed=2 * (N_pad * F_pad + F_pad * H + H * O)
            + 4 * (N_pad * O + H + O)),
    )(x_p, w1t, b1r, w2t, b2r)
    return out[:N, :O]


def net_forward(x, w1, b1, w2, b2):
    """Pallas equivalent of Net.forward: relu(x @ W1.T + b1) @ W2.T + b2.

    x:  [N, n_feature]
    w1: [n_hidden, n_feature], b1: [n_hidden]   (PyTorch Linear convention)
    w2: [n_output, n_hidden],  b2: [n_output]
    """
    F = x.shape[1]
    O = w2.shape[0]
    if F == 1 and O == 1:
        return _forward_vpu(x, w1, b1, w2, b2)
    return _forward_mxu(x, w1, b1, w2, b2)


def reference_forward(x, w1, b1, w2, b2):
    h = jnp.maximum(x @ w1.T + b1, 0.0)
    return h @ w2.T + b2


if __name__ == "__main__":
    # Shapes implied by the module's usage: x = linspace(-1, 1, 100).unsqueeze(1)
    # -> N=100, n_feature=1; tutorial-sized hidden=10, output=1.
    N, n_feature, n_hidden, n_output = 100, 1, 10, 1

    key = jax.random.PRNGKey(0)
    k1, k2, k3, k4 = jax.random.split(key, 4)

    w1 = jax.random.uniform(k1, (n_hidden, n_feature), jnp.float32, -1.0, 1.0)
    b1 = jax.random.uniform(k2, (n_hidden,), jnp.float32, -1.0, 1.0)
    w2 = jax.random.uniform(k3, (n_output, n_hidden), jnp.float32, -0.5, 0.5)
    b2 = jax.random.uniform(k4, (n_output,), jnp.float32, -0.5, 0.5)

    x = jnp.linspace(-1.0, 1.0, N, dtype=jnp.float32).reshape(N, 1)

    out = jax.block_until_ready(net_forward(x, w1, b1, w2, b2))
    ref = reference_forward(x, w1, b1, w2, b2)

    assert out.shape == (N, n_output)
    assert jnp.allclose(out, ref, atol=1e-5, rtol=1e-5), "mismatch vs reference"

    print("KERNEL_OK")
</pallas_src>

<mosaic_0001>
module attributes {stable_mosaic.version = 11 : i64} {
  func.func @kernel(%arg0: i32, %arg1: memref<8x128xf32, #tpu.memory_space<vmem>>, %arg2: memref<10xf32, #tpu.memory_space<smem>>, %arg3: memref<10xf32, #tpu.memory_space<smem>>, %arg4: memref<10xf32, #tpu.memory_space<smem>>, %arg5: memref<1xf32, #tpu.memory_space<smem>>, %arg6: memref<8x128xf32, #tpu.memory_space<vmem>>) attributes {dimension_semantics = [#tpu.dimension_semantics<parallel>], iteration_bounds = array<i64: 1>, scalar_prefetch = 0 : i64, scratch_operands = 0 : i64, tpu.core_type = #tpu.core_type<tc>, window_params = [{transform_indices = @transform_0, window_bounds = array<i64: 8, 128>}, {transform_indices = @transform_1, window_bounds = array<i64: 10>}, {transform_indices = @transform_2, window_bounds = array<i64: 10>}, {transform_indices = @transform_3, window_bounds = array<i64: 10>}, {transform_indices = @transform_4, window_bounds = array<i64: 1>}, {transform_indices = @transform_5, window_bounds = array<i64: 8, 128>}]} {
    %c0 = arith.constant 0 : index
    %c0_0 = arith.constant 0 : index
    %0 = vector.load %arg1[%c0, %c0_0] : memref<8x128xf32, #tpu.memory_space<vmem>>, vector<8x128xf32>
    %c0_1 = arith.constant 0 : index
    %1 = memref.load %arg5[%c0_1] : memref<1xf32, #tpu.memory_space<smem>>
    %2 = vector.broadcast %1 : f32 to vector<8x128xf32>
    %c0_i32 = arith.constant 0 : i32
    %3 = arith.index_cast %c0_i32 : i32 to index
    %4 = memref.load %arg2[%3] : memref<10xf32, #tpu.memory_space<smem>>
    %5 = vector.broadcast %4 : f32 to vector<8x128xf32>
    %6 = arith.mulf %0, %5 : vector<8x128xf32>
    %7 = arith.index_cast %c0_i32 : i32 to index
    %8 = memref.load %arg3[%7] : memref<10xf32, #tpu.memory_space<smem>>
    %9 = vector.broadcast %8 : f32 to vector<8x128xf32>
    %10 = arith.addf %6, %9 : vector<8x128xf32>
    %cst = arith.constant 0.000000e+00 : f32
    %11 = vector.broadcast %cst : f32 to vector<8x128xf32>
    %12 = arith.maximumf %10, %11 : vector<8x128xf32>
    %13 = arith.index_cast %c0_i32 : i32 to index
    %14 = memref.load %arg4[%13] : memref<10xf32, #tpu.memory_space<smem>>
    %15 = vector.broadcast %14 : f32 to vector<8x128xf32>
    %16 = arith.mulf %12, %15 : vector<8x128xf32>
    %17 = arith.addf %2, %16 : vector<8x128xf32>
    %c1_i32 = arith.constant 1 : i32
    %18 = arith.index_cast %c1_i32 : i32 to index
    %19 = memref.load %arg2[%18] : memref<10xf32, #tpu.memory_space<smem>>
    %20 = vector.broadcast %19 : f32 to vector<8x128xf32>
    %21 = arith.mulf %0, %20 : vector<8x128xf32>
    %22 = arith.index_cast %c1_i32 : i32 to index
    %23 = memref.load %arg3[%22] : memref<10xf32, #tpu.memory_space<smem>>
    %24 = vector.broadcast %23 : f32 to vector<8x128xf32>
    %25 = arith.addf %21, %24 : vector<8x128xf32>
    %cst_2 = arith.constant 0.000000e+00 : f32
    %26 = vector.broadcast %cst_2 : f32 to vector<8x128xf32>
    %27 = arith.maximumf %25, %26 : vector<8x128xf32>
    %28 = arith.index_cast %c1_i32 : i32 to index
    %29 = memref.load %arg4[%28] : memref<10xf32, #tpu.memory_space<smem>>
    %30 = vector.broadcast %29 : f32 to vector<8x128xf32>
    %31 = arith.mulf %27, %30 : vector<8x128xf32>
    %32 = arith.addf %17, %31 : vector<8x128xf32>
    %c2_i32 = arith.constant 2 : i32
    %33 = arith.index_cast %c2_i32 : i32 to index
    %34 = memref.load %arg2[%33] : memref<10xf32, #tpu.memory_space<smem>>
    %35 = vector.broadcast %34 : f32 to vector<8x128xf32>
    %36 = arith.mulf %0, %35 : vector<8x128xf32>
    %37 = arith.index_cast %c2_i32 : i32 to index
    %38 = memref.load %arg3[%37] : memref<10xf32, #tpu.memory_space<smem>>
    %39 = vector.broadcast %38 : f32 to vector<8x128xf32>
    %40 = arith.addf %36, %39 : vector<8x128xf32>
    %cst_3 = arith.constant 0.000000e+00 : f32
    %41 = vector.broadcast %cst_3 : f32 to vector<8x128xf32>
    %42 = arith.maximumf %40, %41 : vector<8x128xf32>
    %43 = arith.index_cast %c2_i32 : i32 to index
    %44 = memref.load %arg4[%43] : memref<10xf32, #tpu.memory_space<smem>>
    %45 = vector.broadcast %44 : f32 to vector<8x128xf32>
    %46 = arith.mulf %42, %45 : vector<8x128xf32>
    %47 = arith.addf %32, %46 : vector<8x128xf32>
    %c3_i32 = arith.constant 3 : i32
    %48 = arith.index_cast %c3_i32 : i32 to index
    %49 = memref.load %arg2[%48] : memref<10xf32, #tpu.memory_space<smem>>
    %50 = vector.broadcast %49 : f32 to vector<8x128xf32>
    %51 = arith.mulf %0, %50 : vector<8x128xf32>
    %52 = arith.index_cast %c3_i32 : i32 to index
    %53 = memref.load %arg3[%52] : memref<10xf32, #tpu.memory_space<smem>>
    %54 = vector.broadcast %53 : f32 to vector<8x128xf32>
    %55 = arith.addf %51, %54 : vector<8x128xf32>
    %cst_4 = arith.constant 0.000000e+00 : f32
    %56 = vector.broadcast %cst_4 : f32 to vector<8x128xf32>
    %57 = arith.maximumf %55, %56 : vector<8x128xf32>
    %58 = arith.index_cast %c3_i32 : i32 to index
    %59 = memref.load %arg4[%58] : memref<10xf32, #tpu.memory_space<smem>>
    %60 = vector.broadcast %59 : f32 to vector<8x128xf32>
    %61 = arith.mulf %57, %60 : vector<8x128xf32>
    %62 = arith.addf %47, %61 : vector<8x128xf32>
    %c4_i32 = arith.constant 4 : i32
    %63 = arith.index_cast %c4_i32 : i32 to index
    %64 = memref.load %arg2[%63] : memref<10xf32, #tpu.memory_space<smem>>
    %65 = vector.broadcast %64 : f32 to vector<8x128xf32>
    %66 = arith.mulf %0, %65 : vector<8x128xf32>
    %67 = arith.index_cast %c4_i32 : i32 to index
    %68 = memref.load %arg3[%67] : memref<10xf32, #tpu.memory_space<smem>>
    %69 = vector.broadcast %68 : f32 to vector<8x128xf32>
    %70 = arith.addf %66, %69 : vector<8x128xf32>
    %cst_5 = arith.constant 0.000000e+00 : f32
    %71 = vector.broadcast %cst_5 : f32 to vector<8x128xf32>
    %72 = arith.maximumf %70, %71 : vector<8x128xf32>
    %73 = arith.index_cast %c4_i32 : i32 to index
    %74 = memref.load %arg4[%73] : memref<10xf32, #tpu.memory_space<smem>>
    %75 = vector.broadcast %74 : f32 to vector<8x128xf32>
    %76 = arith.mulf %72, %75 : vector<8x128xf32>
    %77 = arith.addf %62, %76 : vector<8x128xf32>
    %c5_i32 = arith.constant 5 : i32
    %78 = arith.index_cast %c5_i32 : i32 to index
    %79 = memref.load %arg2[%78] : memref<10xf32, #tpu.memory_space<smem>>
    %80 = vector.broadcast %79 : f32 to vector<8x128xf32>
    %81 = arith.mulf %0, %80 : vector<8x128xf32>
    %82 = arith.index_cast %c5_i32 : i32 to index
    %83 = memref.load %arg3[%82] : memref<10xf32, #tpu.memory_space<smem>>
    %84 = vector.broadcast %83 : f32 to vector<8x128xf32>
    %85 = arith.addf %81, %84 : vector<8x128xf32>
    %cst_6 = arith.constant 0.000000e+00 : f32
    %86 = vector.broadcast %cst_6 : f32 to vector<8x128xf32>
    %87 = arith.maximumf %85, %86 : vector<8x128xf32>
    %88 = arith.index_cast %c5_i32 : i32 to index
    %89 = memref.load %arg4[%88] : memref<10xf32, #tpu.memory_space<smem>>
    %90 = vector.broadcast %89 : f32 to vector<8x128xf32>
    %91 = arith.mulf %87, %90 : vector<8x128xf32>
    %92 = arith.addf %77, %91 : vector<8x128xf32>
    %c6_i32 = arith.constant 6 : i32
    %93 = arith.index_cast %c6_i32 : i32 to index
    %94 = memref.load %arg2[%93] : memref<10xf32, #tpu.memory_space<smem>>
    %95 = vector.broadcast %94 : f32 to vector<8x128xf32>
    %96 = arith.mulf %0, %95 : vector<8x128xf32>
    %97 = arith.index_cast %c6_i32 : i32 to index
    %98 = memref.load %arg3[%97] : memref<10xf32, #tpu.memory_space<smem>>
    %99 = vector.broadcast %98 : f32 to vector<8x128xf32>
    %100 = arith.addf %96, %99 : vector<8x128xf32>
    %cst_7 = arith.constant 0.000000e+00 : f32
    %101 = vector.broadcast %cst_7 : f32 to vector<8x128xf32>
    %102 = arith.maximumf %100, %101 : vector<8x128xf32>
    %103 = arith.index_cast %c6_i32 : i32 to index
    %104 = memref.load %arg4[%103] : memref<10xf32, #tpu.memory_space<smem>>
    %105 = vector.broadcast %104 : f32 to vector<8x128xf32>
    %106 = arith.mulf %102, %105 : vector<8x128xf32>
    %107 = arith.addf %92, %106 : vector<8x128xf32>
    %c7_i32 = arith.constant 7 : i32
    %108 = arith.index_cast %c7_i32 : i32 to index
    %109 = memref.load %arg2[%108] : memref<10xf32, #tpu.memory_space<smem>>
    %110 = vector.broadcast %109 : f32 to vector<8x128xf32>
    %111 = arith.mulf %0, %110 : vector<8x128xf32>
    %112 = arith.index_cast %c7_i32 : i32 to index
    %113 = memref.load %arg3[%112] : memref<10xf32, #tpu.memory_space<smem>>
    %114 = vector.broadcast %113 : f32 to vector<8x128xf32>
    %115 = arith.addf %111, %114 : vector<8x128xf32>
    %cst_8 = arith.constant 0.000000e+00 : f32
    %116 = vector.broadcast %cst_8 : f32 to vector<8x128xf32>
    %117 = arith.maximumf %115, %116 : vector<8x128xf32>
    %118 = arith.index_cast %c7_i32 : i32 to index
    %119 = memref.load %arg4[%118] : memref<10xf32, #tpu.memory_space<smem>>
    %120 = vector.broadcast %119 : f32 to vector<8x128xf32>
    %121 = arith.mulf %117, %120 : vector<8x128xf32>
    %122 = arith.addf %107, %121 : vector<8x128xf32>
    %c8_i32 = arith.constant 8 : i32
    %123 = arith.index_cast %c8_i32 : i32 to index
    %124 = memref.load %arg2[%123] : memref<10xf32, #tpu.memory_space<smem>>
    %125 = vector.broadcast %124 : f32 to vector<8x128xf32>
    %126 = arith.mulf %0, %125 : vector<8x128xf32>
    %127 = arith.index_cast %c8_i32 : i32 to index
    %128 = memref.load %arg3[%127] : memref<10xf32, #tpu.memory_space<smem>>
    %129 = vector.broadcast %128 : f32 to vector<8x128xf32>
    %130 = arith.addf %126, %129 : vector<8x128xf32>
    %cst_9 = arith.constant 0.000000e+00 : f32
    %131 = vector.broadcast %cst_9 : f32 to vector<8x128xf32>
    %132 = arith.maximumf %130, %131 : vector<8x128xf32>
    %133 = arith.index_cast %c8_i32 : i32 to index
    %134 = memref.load %arg4[%133] : memref<10xf32, #tpu.memory_space<smem>>
    %135 = vector.broadcast %134 : f32 to vector<8x128xf32>
    %136 = arith.mulf %132, %135 : vector<8x128xf32>
    %137 = arith.addf %122, %136 : vector<8x128xf32>
    %c9_i32 = arith.constant 9 : i32
    %138 = arith.index_cast %c9_i32 : i32 to index
    %139 = memref.load %arg2[%138] : memref<10xf32, #tpu.memory_space<smem>>
    %140 = vector.broadcast %139 : f32 to vector<8x128xf32>
    %141 = arith.mulf %0, %140 : vector<8x128xf32>
    %142 = arith.index_cast %c9_i32 : i32 to index
    %143 = memref.load %arg3[%142] : memref<10xf32, #tpu.memory_space<smem>>
    %144 = vector.broadcast %143 : f32 to vector<8x128xf32>
    %145 = arith.addf %141, %144 : vector<8x128xf32>
    %cst_10 = arith.constant 0.000000e+00 : f32
    %146 = vector.broadcast %cst_10 : f32 to vector<8x128xf32>
    %147 = arith.maximumf %145, %146 : vector<8x128xf32>
    %148 = arith.index_cast %c9_i32 : i32 to index
    %149 = memref.load %arg4[%148] : memref<10xf32, #tpu.memory_space<smem>>
    %150 = vector.broadcast %149 : f32 to vector<8x128xf32>
    %151 = arith.mulf %147, %150 : vector<8x128xf32>
    %152 = arith.addf %137, %151 : vector<8x128xf32>
    %c10_i32 = arith.constant 10 : i32
    %c0_11 = arith.constant 0 : index
    %c0_12 = arith.constant 0 : index
    %153 = vector.load %arg6[%c0_11, %c0_12] : memref<8x128xf32, #tpu.memory_space<vmem>>, vector<8x128xf32>
    tpu.vector_store %arg6[%c0_11, %c0_12], %152 {strides = array<i32>} : memref<8x128xf32, #tpu.memory_space<vmem>>, vector<8x128xf32>,
    return
  }
  func.func @transform_0(%arg0: i32) -> (i32, i32) {
    %c0_i32 = arith.constant 0 : i32
    %c0_i32_0 = arith.constant 0 : i32
    return %arg0, %c0_i32 : i32, i32
  }
  func.func @transform_1(%arg0: i32) -> i32 {
    %c0_i32 = arith.constant 0 : i32
    %c0_i32_0 = arith.constant 0 : i32
    return %c0_i32 : i32
  }
  func.func @transform_2(%arg0: i32) -> i32 {
    %c0_i32 = arith.constant 0 : i32
    %c0_i32_0 = arith.constant 0 : i32
    return %c0_i32 : i32
  }
  func.func @transform_3(%arg0: i32) -> i32 {
    %c0_i32 = arith.constant 0 : i32
    %c0_i32_0 = arith.constant 0 : i32
    return %c0_i32 : i32
  }
  func.func @transform_4(%arg0: i32) -> i32 {
    %c0_i32 = arith.constant 0 : i32
    %c0_i32_0 = arith.constant 0 : i32
    return %c0_i32 : i32
  }
  func.func @transform_5(%arg0: i32) -> (i32, i32) {
    %c0_i32 = arith.constant 0 : i32
    %c0_i32_0 = arith.constant 0 : i32
    return %arg0, %c0_i32 : i32, i32
  }
}

</mosaic_0001>

<bundles_post_ra>
// kernel: tpu_custom_call.1
= control target key start
LH: loop header
LB: loop body
LE: loop exit
PB: predicated region body
PF: predicated region fallthrough
CT: control target
= control target key end

     0   :  { %11 = vsyncpa [#allocation4], 0  ;;  %s403_s0 = inlined_call_operand.hbm [shape: f32[8,128], index: 0, kind: input, shape index: {}]   ;;  %s404_s1 = inlined_call_operand.vmem [shape: f32[10], index: 1, kind: input, shape index: {}]   ;;  %s405_s2 = inlined_call_operand.vmem [shape: f32[10], index: 2, kind: input, shape index: {}]   ;;  %s406_s3 = inlined_call_operand.vmem [shape: f32[10], index: 3, kind: input, shape index: {}]   ;;  %s407_s4 = inlined_call_operand.<no memory space> [shape: f32[1], index: 4, kind: input, shape index: {}]   ;;  %s408_s5 = inlined_call_operand.hbm [shape: f32[8,128], index: 5, kind: output, shape index: {}]  }
   0x1   :  { %12 = vsyncpa [#allocation6], 0 }
   0x2   :  { %13 = vsyncpa [#allocation9], 0  ;;  %s41_s20 = sshll.u32 %s405_s2, 4  ;;  %s42_s20 = int_to_ptr.vmem [resolvable:$true] %s41_s20 }
   0x3   :  { %14 = vsyncpa [#allocation5], 0  ;;  %s233_s21 = scalar_lea.vmem %s42_s20, 16  ;;  %p238_p1 = scmp.lt.s32.totalorder %s42_s20, %s42_s20 }
   0x4   :  { %p234_p0 = scmp.ne.s32.totalorder %s42_s20, %s233_s21  ;;  %p239_p2 = scmp.lt.s32.totalorder %s233_s21, %s233_s21 }
   0x6   :  { %p240_p3 = por %p239_p2, %p238_p1 }
   0x8   :  { %p241_p4 = pnand %p240_p3, %p234_p0 }
   0xa   :  { %244 = shalt.err (!%p241_p4)
}
   0xb   :  { %s317_s22 = smov [#allocation8]   ;;  %s318_s23 = smov [#allocation3]  }
   0xc   :  { %44 = dma.vmem_to_smem %s42_s20, 16, %s317_s22, [#allocation9]  }
   0xd   :  { %s21_s24 = sshll.u32 %s318_s23, 4  ;;  %s31_s27 = sshll.u32 %s404_s1, 4  ;;  %s22_s24 = int_to_ptr.vmem [resolvable:$true] %s21_s24  ;;  %s32_s27 = int_to_ptr.vmem [resolvable:$true] %s31_s27 }
   0xe   :  { %s253_s2 = scalar_lea.vmem %s22_s24, 128  ;;  %p258_p6 = scmp.lt.s32.totalorder %s22_s24, %s22_s24 }
   0xf   :  { %p254_p5 = scmp.ne.s32.totalorder %s22_s24, %s253_s2  ;;  %p259_p7 = scmp.lt.s32.totalorder %s253_s2, %s253_s2 }
  0x11   :  { %p260_p8 = por %p259_p7, %p258_p6 }
  0x13   :  { %p261_p9 = pnand %p260_p8, %p254_p5 }
  0x15   :  { %264 = shalt.err (!%p261_p9)
}
  0x16   :  { %24 = dma.hbm_to_vmem [thread:$0]  %s403_s0, 128, %s22_s24, [#allocation4]  }
  0x17   :  { %s51_s7 = sshll.u32 %s406_s3, 4  ;;  %s265_s8 = scalar_lea.vmem %s32_s27, 16  ;;  %s52_s7 = int_to_ptr.vmem [resolvable:$true] %s51_s7 }
  0x18   :  { %p266_p10 = scmp.ne.s32.totalorder %s32_s27, %s265_s8  ;;  %p270_p11 = scmp.lt.s32.totalorder %s32_s27, %s32_s27 }
  0x19   :  { %p271_p12 = scmp.lt.s32.totalorder %s265_s8, %s265_s8 }
  0x1b   :  { %p272_p13 = por %p271_p12, %p270_p11 }
  0x1d   :  { %p273_p0 = pnand %p272_p13, %p266_p10 }
  0x1f   :  { %276 = shalt.err (!%p273_p0)
}
  0x20   :  { %s319_s1 = smov [#allocation7]   ;;  %s277_s9 = scalar_lea.vmem %s52_s7, 16 }
  0x21   :  { %34 = dma.vmem_to_smem %s32_s27, 16, %s319_s1, [#allocation6]  }
  0x22   :  { %p278_p1 = scmp.ne.s32.totalorder %s52_s7, %s277_s9  ;;  %p282_p2 = scmp.lt.s32.totalorder %s52_s7, %s52_s7 }
  0x23   :  { %p283_p3 = scmp.lt.s32.totalorder %s277_s9, %s277_s9 }
  0x25   :  { %p284_p4 = por %p283_p3, %p282_p2 }
  0x27   :  { %p285_p5 = pnand %p284_p4, %p278_p1 }
  0x29   :  { %288 = shalt.err (!%p285_p5)
}
  0x2a   :  { %s320_s0 = smov [#allocation10]  }
  0x2b   :  { %54 = dma.vmem_to_smem %s52_s7, 16, %s320_s0, [#allocation9]  }
  0x2c   :  { %309 = dma.done.wait [#allocation4], 128  }
  0x2d   :  { %310 = vsyncadd [#allocation4], 4294967168 }
  0x2e   :  { %311 = dma.done.wait [#allocation6], 16  }
  0x2f   :  { %312 = vsyncadd [#allocation6], 4294967280 }
  0x30   :  { %313 = dma.done.wait [#allocation9], 32  }
  0x31   :  { %314 = vsyncadd [#allocation9], 4294967264 }
  0x32   :  { %69 = sfence }
  0x33   :  { %s73_s3 = sld [smem:[#allocation7]]  ;;  %v364_v0 = vld [vmem:[#allocation3] sm:$0xff]  ;;  %v72_v10 = vstv %s407_s4 }
  0x34   :  { %s76_s10 = sld [smem:[#allocation8]] }
  0x35   :  { %s80_s11 = sld [smem:[#allocation10]] }
  0x36   :  { %s201_s12 = sld [smem:[#allocation7 + $0x1]] }
  0x37   :  { %s202_s13 = sld [smem:[#allocation8 + $0x1]] }
  0x38   :  { %s366_s14 = sld [smem:[#allocation10 + $0x1]] }
  0x39   :  { %v74_v1 = vstv %s73_s3  ;;  %s204_s15 = sld [smem:[#allocation7 + $0x2]] }
  0x3a   :  { %v75_v2 = vmul.f32 %v74_v1, %v364_v0  ;;  %v77_v3 = vstv %s76_s10  ;;  %s205_s16 = sld [smem:[#allocation8 + $0x2]] }
  0x3b   :  { %s369_s17 = sld [smem:[#allocation10 + $0x2]]  ;;  %v81_v6 = vstv %s80_s11  ;;  %s321_s11 = smov [#allocation11]  }
  0x3c   :  { %v78_v4 = vadd.f32 %v77_v3, %v75_v2  ;;  %v85_v5 = vstv %s201_s12  ;;  %s207_s18 = sld [smem:[#allocation7 + $0x3]]  ;;  %s190_s12 = sshll.u32 %s321_s11, 4  ;;  %s191_s12 = int_to_ptr.vmem [resolvable:$true] %s190_s12 }
  0x3d   :  { %v86_v7 = vmul.f32 %v85_v5, %v364_v0  ;;  %v88_v8 = vstv %s202_s13  ;;  %s208_s19 = sld [smem:[#allocation8 + $0x3]]  ;;  %s289_s13 = scalar_lea.vmem %s191_s12, 128 }
  0x3e   :  { %v79_v9 = vmax.f32 %v78_v4, 0.0  ;;  %s372_s20 = sld [smem:[#allocation10 + $0x3]]  ;;  %v92_v14 = vstv %s366_s14  ;;  %p290_p6 = scmp.ne.s32.totalorder %s191_s12, %s289_s13 }
  0x3f   :  { %v89_v11 = vadd.f32 %v88_v8, %v86_v7  ;;  %v96_v12 = vstv %s204_s15  ;;  %s210_s23 = sld [smem:[#allocation7 + $0x4]]  ;;  %p294_p7 = scmp.lt.s32.totalorder %s191_s12, %s191_s12 }
  0x40   :  { %v82_v13 = vmul.f32 %v81_v6, %v79_v9  ;;  %v97_v15 = vmul.f32 %v96_v12, %v364_v0  ;;  %v99_v16 = vstv %s205_s16  ;;  %s211_s24 = sld [smem:[#allocation8 + $0x4]]  ;;  %p295_p8 = scmp.lt.s32.totalorder %s289_s13, %s289_s13 }
  0x41   :  { %v90_v17 = vmax.f32 %v89_v11, 0.0  ;;  %s379_s25 = sld [smem:[#allocation10 + $0x4]]  ;;  %v103_v22 = vstv %s369_s17 }
  0x42   :  { %v83_v18 = vadd.f32 %v82_v13, %v72_v10  ;;  %v100_v19 = vadd.f32 %v99_v16, %v97_v15  ;;  %v107_v20 = vstv %s207_s18  ;;  %s213_s26 = sld [smem:[#allocation7 + $0x5]]  ;;  %p296_p9 = por %p295_p8, %p294_p7 }
  0x43   :  { %v93_v21 = vmul.f32 %v92_v14, %v90_v17  ;;  %v108_v23 = vmul.f32 %v107_v20, %v364_v0  ;;  %v110_v24 = vstv %s208_s19  ;;  %s214_s4 = sld [smem:[#allocation8 + $0x5]] }
  0x44   :  { %v101_v25 = vmax.f32 %v100_v19, 0.0  ;;  %s383_s27 = sld [smem:[#allocation10 + $0x5]]  ;;  %v114_v30 = vstv %s372_s20  ;;  %p297_p10 = pnand %p296_p9, %p290_p6 }
  0x45   :  { %v94_v26 = vadd.f32 %v93_v21, %v83_v18  ;;  %v111_v27 = vadd.f32 %v110_v24, %v108_v23  ;;  %v118_v28 = vstv %s210_s23  ;;  %s216_s2 = sld [smem:[#allocation7 + $0x6]] }
  0x46   :  { %v104_v29 = vmul.f32 %v103_v22, %v101_v25  ;;  %v119_v31 = vmul.f32 %v118_v28, %v364_v0  ;;  %v121_v32 = vstv %s211_s24  ;;  %s217_s28 = sld [smem:[#allocation8 + $0x6]] }
  0x47   :  { %v112_v33 = vmax.f32 %v111_v27, 0.0  ;;  %s387_s29 = sld [smem:[#allocation10 + $0x6]]  ;;  %v125_v38 = vstv %s379_s25 }
  0x48   :  { %v105_v34 = vadd.f32 %v104_v29, %v94_v26  ;;  %v122_v35 = vadd.f32 %v121_v32, %v119_v31  ;;  %v129_v36 = vstv %s213_s26  ;;  %s219_s30 = sld [smem:[#allocation7 + $0x7]] }
  0x49   :  { %v115_v37 = vmul.f32 %v114_v30, %v112_v33  ;;  %v130_v39 = vmul.f32 %v129_v36, %v364_v0  ;;  %v132_v40 = vstv %s214_s4  ;;  %s220_s6 = sld [smem:[#allocation8 + $0x7]] }
  0x4a   :  { %v123_v41 = vmax.f32 %v122_v35, 0.0  ;;  %s391_s7 = sld [smem:[#allocation10 + $0x7]]  ;;  %v136_v46 = vstv %s383_s27 }
  0x4b   :  { %v116_v42 = vadd.f32 %v115_v37, %v105_v34  ;;  %v133_v43 = vadd.f32 %v132_v40, %v130_v39  ;;  %v140_v44 = vstv %s216_s2  ;;  %s222_s8 = sld [smem:[#allocation7 + $0x8]] }
  0x4c   :  { %v126_v45 = vmul.f32 %v125_v38, %v123_v41  ;;  %v141_v47 = vmul.f32 %v140_v44, %v364_v0  ;;  %v143_v48 = vstv %s217_s28  ;;  %s223_s1 = sld [smem:[#allocation8 + $0x8]] }
  0x4d   :  { %v134_v49 = vmax.f32 %v133_v43, 0.0  ;;  %s224_s9 = sld [smem:[#allocation10 + $0x8]]  ;;  %v147_v54 = vstv %s387_s29 }
  0x4e   :  { %v127_v50 = vadd.f32 %v126_v45, %v116_v42  ;;  %v144_v51 = vadd.f32 %v143_v48, %v141_v47  ;;  %v151_v52 = vstv %s219_s30  ;;  %s225_s0 = sld [smem:[#allocation7 + $0x9]] }
  0x4f   :  { %v137_v53 = vmul.f32 %v136_v46, %v134_v49  ;;  %v152_v55 = vmul.f32 %v151_v52, %v364_v0  ;;  %v154_v56 = vstv %s220_s6  ;;  %s226_s3 = sld [smem:[#allocation8 + $0x9]] }
  0x50   :  { %v145_v57 = vmax.f32 %v144_v51, 0.0  ;;  %s227_s10 = sld [smem:[#allocation10 + $0x9]]  ;;  %v158_v62 = vstv %s391_s7 }
  0x51   :  { %v138_v58 = vadd.f32 %v137_v53, %v127_v50  ;;  %v155_v59 = vadd.f32 %v154_v56, %v152_v55  ;;  %v162_v60 = vstv %s222_s8 }
  0x52   :  { %v148_v61 = vmul.f32 %v147_v54, %v145_v57  ;;  %v163_v63 = vmul.f32 %v162_v60, %v364_v0  ;;  %v165_v1 = vstv %s223_s1 }
  0x53   :  { %v156_v2 = vmax.f32 %v155_v59, 0.0  ;;  %v169_v7 = vstv %s224_s9 }
  0x54   :  { %v149_v3 = vadd.f32 %v148_v61, %v138_v58  ;;  %v166_v4 = vadd.f32 %v165_v1, %v163_v63  ;;  %v173_v5 = vstv %s225_s0 }
  0x55   :  { %v159_v6 = vmul.f32 %v158_v62, %v156_v2  ;;  %v174_v8 = vmul.f32 %v173_v5, %v364_v0  ;;  %v176_v9 = vstv %s226_s3 }
  0x56   :  { %v167_v10 = vmax.f32 %v166_v4, 0.0  ;;  %v180_v14 = vstv %s227_s10 }
  0x57   :  { %v160_v11 = vadd.f32 %v159_v6, %v149_v3  ;;  %v177_v12 = vadd.f32 %v176_v9, %v174_v8 }
  0x58   :  { %v170_v13 = vmul.f32 %v169_v7, %v167_v10 }
  0x59   :  { %v178_v15 = vmax.f32 %v177_v12, 0.0 }
  0x5a   :  { %v171_v16 = vadd.f32 %v170_v13, %v160_v11 }
  0x5b   :  { %v181_v17 = vmul.f32 %v180_v14, %v178_v15 }
  0x5d   :  { %v182_v18 = vadd.f32 %v181_v17, %v171_v16 }
  0x5f   :  { %183 = vst [vmem:[#allocation11] sm:$0xff] %v182_v18 }
  0x60   :  { %300 = shalt.err (!%p297_p10)
}
  0x61   :  { %193 = dma.vmem_to_hbm [thread:$0]  %s191_s12, 128, %s408_s5, [#allocation5]  }
  0x62   :  { %315 = dma.done.wait [#allocation5], 128  }
  0x63   :  { %316 = vsyncadd [#allocation5], 4294967168 }
  0x64   :  { %197 = vsyncpa [#allocation4], 1 }
  0x65   :  { %198 = vsyncpa [#allocation5], 1 }
  0x66   :  { %199 = vsyncpa [#allocation6], 1 }
  0x67   :  { %200 = vsyncpa [#allocation9], 1 }

</bundles_post_ra>
